<compile_context>
chip_gen: v7x
topology: tpu7x:2x2x1
jax: 0.10.0
libtpu: 0.0.40
codegen_flags: <defaults>
</compile_context>

<pallas_src>
import jax
import jax.numpy as jnp
from jax.experimental import pallas as pl
from jax.experimental.pallas import tpu as pltpu

IN_DIM = 1024
HID_DIM = 512
OUT_DIM = 10
OUT_PAD = 128  # lane-dense padded output width (multiple of 128 lanes)


def mlp_kernel(x_ref, w1_ref, b1_ref, w2_ref, b2_ref, o_ref):
    # fc1: bf16 x bf16 on the MXU with f32 accumulation; bias + ReLU in f32 (VPU).
    h = jnp.dot(x_ref[...], w1_ref[...], preferred_element_type=jnp.float32)
    h = jnp.maximum(h + b1_ref[...], 0.0)
    # fc2: activations cast to bf16; output columns padded to 128 -> lane-dense store.
    y = jnp.dot(h.astype(w2_ref.dtype), w2_ref[...],
                preferred_element_type=jnp.float32)
    o_ref[...] = (y + b2_ref[...]).astype(o_ref.dtype)


def simple_model_forward(x, w1, b1, w2, b2):
    """x: [B, 1024]; w1: [1024, 512]; b1: [512]; w2: [512, 10]; b2: [10].

    Weights are stored in [in, out] layout (transpose of PyTorch's [out, in]).
    Returns [B, 10] float32: relu(x @ w1 + b1) @ w2 + b2.
    """
    B = x.shape[0]

    # bf16 for the HBM-dominant operands; biases stay f32 (accumulate path is f32).
    x_bf = x.astype(jnp.bfloat16)
    w1_bf = w1.astype(jnp.bfloat16)
    w2_pad = jnp.zeros((HID_DIM, OUT_PAD), jnp.bfloat16).at[:, :OUT_DIM].set(
        w2.astype(jnp.bfloat16))
    b1_2d = b1.reshape(1, HID_DIM).astype(jnp.float32)
    b2_pad = jnp.zeros((1, OUT_PAD), jnp.float32).at[:, :OUT_DIM].set(
        b2.astype(jnp.float32))

    # Batch tiling: one tile for small B (block == full dim satisfies tiling rules),
    # 512-row tiles for large B so DMA/compute pipeline and the per-step VMEM
    # footprint stays well under v5e's 16 MiB scoped default / v7x's 64 MiB VMEM.
    tm = B if B <= 512 else 512
    grid = (pl.cdiv(B, tm),)

    flops = 2 * B * (IN_DIM * HID_DIM + HID_DIM * OUT_PAD)
    bytes_accessed = (x_bf.size * 2 + w1_bf.size * 2 + w2_pad.size * 2
                      + b1_2d.size * 4 + b2_pad.size * 4 + B * OUT_PAD * 4)

    out_padded = pl.pallas_call(
        mlp_kernel,
        out_shape=jax.ShapeDtypeStruct((B, OUT_PAD), jnp.float32),
        grid=grid,
        in_specs=[
            pl.BlockSpec((tm, IN_DIM), lambda i: (i, 0)),        # x: batch-tiled
            pl.BlockSpec((IN_DIM, HID_DIM), lambda i: (0, 0)),   # W1 resident (DMA'd once)
            pl.BlockSpec((1, HID_DIM), lambda i: (0, 0)),        # b1 resident
            pl.BlockSpec((HID_DIM, OUT_PAD), lambda i: (0, 0)),  # W2 resident
            pl.BlockSpec((1, OUT_PAD), lambda i: (0, 0)),        # b2 resident
        ],
        out_specs=pl.BlockSpec((tm, OUT_PAD), lambda i: (i, 0)),
        compiler_params=pltpu.CompilerParams(
            dimension_semantics=("parallel",),  # batch axis -> both TCs on v7x
        ),
        cost_estimate=pl.CostEstimate(
            flops=flops, transcendentals=0, bytes_accessed=bytes_accessed),
    )(x_bf, w1_bf, b1_2d, w2_pad, b2_pad)

    return out_padded[:, :OUT_DIM]


def reference_forward(x, w1, b1, w2, b2):
    h = jnp.maximum(x @ w1 + b1, 0.0)
    return h @ w2 + b2


if __name__ == "__main__":
    key = jax.random.PRNGKey(0)
    kx, k1, kb1, k2, kb2 = jax.random.split(key, 5)

    B = 8
    x = jax.random.normal(kx, (B, IN_DIM), dtype=jnp.float32)
    lim1 = 1.0 / (IN_DIM ** 0.5)
    lim2 = 1.0 / (HID_DIM ** 0.5)
    # Stored directly in [in, out] layout (transpose of PyTorch's [out, in]).
    w1 = jax.random.uniform(k1, (IN_DIM, HID_DIM), jnp.float32, -lim1, lim1)
    b1 = jax.random.uniform(kb1, (HID_DIM,), jnp.float32, -lim1, lim1)
    w2 = jax.random.uniform(k2, (HID_DIM, OUT_DIM), jnp.float32, -lim2, lim2)
    b2 = jax.random.uniform(kb2, (OUT_DIM,), jnp.float32, -lim2, lim2)

    out = simple_model_forward(x, w1, b1, w2, b2)
    out = jax.block_until_ready(out)

    ref = reference_forward(x, w1, b1, w2, b2)
    assert out.shape == (B, OUT_DIM)
    # Tolerance loosened for bf16 inputs/weights (f32 accumulation keeps it tight-ish).
    assert jnp.allclose(out, ref, atol=3e-2, rtol=3e-2), "mismatch vs reference"

    print("KERNEL_OK")
</pallas_src>

<mosaic_0001>
module attributes {stable_mosaic.version = 11 : i64} {
  func.func @mlp_kernel(%arg0: i32, %arg1: memref<8x1024xbf16, #tpu.memory_space<vmem>>, %arg2: memref<1024x512xbf16, #tpu.memory_space<vmem>>, %arg3: memref<1x512xf32, #tpu.memory_space<vmem>>, %arg4: memref<512x128xbf16, #tpu.memory_space<vmem>>, %arg5: memref<1x128xf32, #tpu.memory_space<vmem>>, %arg6: memref<8x128xf32, #tpu.memory_space<vmem>>) attributes {dimension_semantics = [#tpu.dimension_semantics<parallel>], iteration_bounds = array<i64: 1>, scalar_prefetch = 0 : i64, scratch_operands = 0 : i64, tpu.core_type = #tpu.core_type<tc>, window_params = [{transform_indices = @transform_0, window_bounds = array<i64: 8, 1024>}, {pipeline_mode = #tpu.pipeline_mode<synchronous>, transform_indices = @transform_1, window_bounds = array<i64: 1024, 512>}, {pipeline_mode = #tpu.pipeline_mode<synchronous>, transform_indices = @transform_2, window_bounds = array<i64: 1, 512>}, {pipeline_mode = #tpu.pipeline_mode<synchronous>, transform_indices = @transform_3, window_bounds = array<i64: 512, 128>}, {pipeline_mode = #tpu.pipeline_mode<synchronous>, transform_indices = @transform_4, window_bounds = array<i64: 1, 128>}, {transform_indices = @transform_5, window_bounds = array<i64: 8, 128>}]} {
    %c0 = arith.constant 0 : index
    %c0_0 = arith.constant 0 : index
    %0 = vector.load %arg1[%c0, %c0_0] : memref<8x1024xbf16, #tpu.memory_space<vmem>>, vector<8x1024xbf16>
    %c0_1 = arith.constant 0 : index
    %c0_2 = arith.constant 0 : index
    %1 = vector.load %arg2[%c0_1, %c0_2] : memref<1024x512xbf16, #tpu.memory_space<vmem>>, vector<1024x512xbf16>
    %cst = arith.constant dense<0.000000e+00> : vector<8x512xf32>
    %2 = tpu.matmul %0, %1, %cst {dimension_numbers = #tpu.dot_dimension_numbers<[1], [0], [0], [1], [0, 0, 1, 1], [], []>} : vector<8x1024xbf16>, vector<1024x512xbf16>, vector<8x512xf32> -> vector<8x512xf32>
    %c0_3 = arith.constant 0 : index
    %c0_4 = arith.constant 0 : index
    %3 = vector.load %arg3[%c0_3, %c0_4] : memref<1x512xf32, #tpu.memory_space<vmem>>, vector<1x512xf32>
    %4 = vector.broadcast %3 : vector<1x512xf32> to vector<8x512xf32>
    %5 = arith.addf %2, %4 : vector<8x512xf32>
    %cst_5 = arith.constant 0.000000e+00 : f32
    %6 = vector.broadcast %cst_5 : f32 to vector<8x512xf32>
    %7 = arith.maximumf %5, %6 : vector<8x512xf32>
    %8 = arith.truncf %7 : vector<8x512xf32> to vector<8x512xbf16>
    %c0_6 = arith.constant 0 : index
    %c0_7 = arith.constant 0 : index
    %9 = vector.load %arg4[%c0_6, %c0_7] : memref<512x128xbf16, #tpu.memory_space<vmem>>, vector<512x128xbf16>
    %cst_8 = arith.constant dense<0.000000e+00> : vector<8x128xf32>
    %10 = tpu.matmul %8, %9, %cst_8 {dimension_numbers = #tpu.dot_dimension_numbers<[1], [0], [0], [1], [0, 0, 1, 1], [], []>} : vector<8x512xbf16>, vector<512x128xbf16>, vector<8x128xf32> -> vector<8x128xf32>
    %c0_9 = arith.constant 0 : index
    %c0_10 = arith.constant 0 : index
    %11 = vector.load %arg5[%c0_9, %c0_10] : memref<1x128xf32, #tpu.memory_space<vmem>>, vector<1x128xf32>
    %12 = vector.broadcast %11 : vector<1x128xf32> to vector<8x128xf32>
    %13 = arith.addf %10, %12 : vector<8x128xf32>
    %c0_11 = arith.constant 0 : index
    %c0_12 = arith.constant 0 : index
    %14 = vector.load %arg6[%c0_11, %c0_12] : memref<8x128xf32, #tpu.memory_space<vmem>>, vector<8x128xf32>
    tpu.vector_store %arg6[%c0_11, %c0_12], %13 {strides = array<i32>} : memref<8x128xf32, #tpu.memory_space<vmem>>, vector<8x128xf32>,
    return
  }
  func.func @transform_0(%arg0: i32) -> (i32, i32) {
    %c0_i32 = arith.constant 0 : i32
    %c0_i32_0 = arith.constant 0 : i32
    return %arg0, %c0_i32 : i32, i32
  }
  func.func @transform_1(%arg0: i32) -> (i32, i32) {
    %c0_i32 = arith.constant 0 : i32
    %c0_i32_0 = arith.constant 0 : i32
    %c0_i32_1 = arith.constant 0 : i32
    return %c0_i32, %c0_i32_0 : i32, i32
  }
  func.func @transform_2(%arg0: i32) -> (i32, i32) {
    %c0_i32 = arith.constant 0 : i32
    %c0_i32_0 = arith.constant 0 : i32
    %c0_i32_1 = arith.constant 0 : i32
    return %c0_i32, %c0_i32_0 : i32, i32
  }
  func.func @transform_3(%arg0: i32) -> (i32, i32) {
    %c0_i32 = arith.constant 0 : i32
    %c0_i32_0 = arith.constant 0 : i32
    %c0_i32_1 = arith.constant 0 : i32
    return %c0_i32, %c0_i32_0 : i32, i32
  }
  func.func @transform_4(%arg0: i32) -> (i32, i32) {
    %c0_i32 = arith.constant 0 : i32
    %c0_i32_0 = arith.constant 0 : i32
    %c0_i32_1 = arith.constant 0 : i32
    return %c0_i32, %c0_i32_0 : i32, i32
  }
  func.func @transform_5(%arg0: i32) -> (i32, i32) {
    %c0_i32 = arith.constant 0 : i32
    %c0_i32_0 = arith.constant 0 : i32
    return %arg0, %c0_i32 : i32, i32
  }
}

</mosaic_0001>

<bundles_post_ra>
// kernel: tpu_custom_call.1
= control target key start
LH: loop header
LB: loop body
LE: loop exit
PB: predicated region body
PF: predicated region fallthrough
CT: control target
= control target key end

     0   :  { %10 = vsyncpa [#allocation3], 0  ;;  %s3352_s0 = inlined_call_operand.hbm [shape: bf16[8,1024], index: 0, kind: input, shape index: {}]   ;;  %s3353_s1 = inlined_call_operand.hbm [shape: bf16[1024,512], index: 1, kind: input, shape index: {}]   ;;  %s3354_s2 = inlined_call_operand.vmem [shape: f32[1,512], index: 2, kind: input, shape index: {}]   ;;  %s3355_s3 = inlined_call_operand.hbm [shape: bf16[512,128], index: 3, kind: input, shape index: {}]   ;;  %s3356_s4 = inlined_call_operand.vmem [shape: f32[1,128], index: 4, kind: input, shape index: {}]   ;;  %s3357_s5 = inlined_call_operand.hbm [shape: f32[8,128], index: 5, kind: output, shape index: {}]  }
   0x1   :  { %11 = vsyncpa [#allocation6], 0 }
   0x2   :  { %12 = vsyncpa [#allocation4], 0  ;;  %s3242_s18 = smov [#allocation5]   ;;  %s3148_s22 = scalar_lea.hbm %s3353_s1, 32768 }
   0x3   :  { %s28_s19 = sshll.u32 %s3242_s18, 4  ;;  %p3149_p0 = scmp.ne.s32.totalorder %s3353_s1, %s3148_s22  ;;  %s29_s19 = int_to_ptr.vmem [resolvable:$true] %s28_s19 }
   0x4   :  { %p3152_p1 = scmp.lt.u32.totalorder %s3148_s22, %s3353_s1 }
   0x6   :  { %p3154_p2 = pnand %p3152_p1, %p3149_p0 }
   0x8   :  { %3157 = shalt.err (!%p3154_p2)
}
   0x9   :  { %s3158_s27 = scalar_lea.vmem %s29_s19, 32768  ;;  %p3163_p4 = scmp.lt.s32.totalorder %s29_s19, %s29_s19 }
   0xa   :  { %p3159_p3 = scmp.ne.s32.totalorder %s29_s19, %s3158_s27  ;;  %p3164_p5 = scmp.lt.s32.totalorder %s3158_s27, %s3158_s27 }
   0xc   :  { %p3165_p6 = por %p3164_p5, %p3163_p4 }
   0xe   :  { %p3166_p7 = pnand %p3165_p6, %p3159_p3 }
  0x10   :  { %3169 = shalt.err (!%p3166_p7)
}
  0x11   :  { %s3243_s28 = smov 256   ;;  %s3244_s29 = smov 16  }
  0x12   :  { %34 = dma.hbm_to_vmem [thread:$0]  %s3353_s1, 32768, %s29_s19, [#allocation6], %s3243_s28, %s3243_s28, %s3244_s29  }
  0x13   :  { %s3245_s7 = smov [#allocation2]   ;;  %s3246_s9 = smov [#allocation7]  }
  0x14   :  { %s19_s8 = sshll.u32 %s3245_s7, 4  ;;  %s42_s10 = sshll.u32 %s3246_s9, 4  ;;  %s20_s8 = int_to_ptr.vmem [resolvable:$true] %s19_s8  ;;  %s43_s10 = int_to_ptr.vmem [resolvable:$true] %s42_s10 }
  0x15   :  { %s3170_s13 = scalar_lea.hbm %s3352_s0, 512 }
  0x16   :  { %p3171_p8 = scmp.ne.s32.totalorder %s3352_s0, %s3170_s13  ;;  %p3174_p9 = scmp.lt.u32.totalorder %s3170_s13, %s3352_s0 }
  0x18   :  { %p3176_p10 = pnand %p3174_p9, %p3171_p8 }
  0x1a   :  { %3179 = shalt.err (!%p3176_p10)
}
  0x1b   :  { %s3180_s1 = scalar_lea.vmem %s20_s8, 512  ;;  %p3185_p12 = scmp.lt.s32.totalorder %s20_s8, %s20_s8 }
  0x1c   :  { %p3181_p11 = scmp.ne.s32.totalorder %s20_s8, %s3180_s1  ;;  %p3186_p13 = scmp.lt.s32.totalorder %s3180_s1, %s3180_s1 }
  0x1e   :  { %p3187_p0 = por %p3186_p13, %p3185_p12 }
  0x20   :  { %p3188_p1 = pnand %p3187_p0, %p3181_p11 }
  0x22   :  { %3191 = shalt.err (!%p3188_p1)
}
  0x23   :  { %22 = dma.hbm_to_vmem [thread:$0]  %s3352_s0, 512, %s20_s8, [#allocation3]  }
  0x24   :  { %s3192_s22 = scalar_lea.hbm %s3355_s3, 4096 }
  0x25   :  { %p3193_p2 = scmp.ne.s32.totalorder %s3355_s3, %s3192_s22  ;;  %p3196_p3 = scmp.lt.u32.totalorder %s3192_s22, %s3355_s3 }
  0x27   :  { %p3198_p4 = pnand %p3196_p3, %p3193_p2 }
  0x29   :  { %3201 = shalt.err (!%p3198_p4)
}
  0x2a   :  { %s3202_s27 = scalar_lea.vmem %s43_s10, 4096  ;;  %p3207_p6 = scmp.lt.s32.totalorder %s43_s10, %s43_s10 }
  0x2b   :  { %p3203_p5 = scmp.ne.s32.totalorder %s43_s10, %s3202_s27  ;;  %p3208_p7 = scmp.lt.s32.totalorder %s3202_s27, %s3202_s27 }
  0x2d   :  { %p3209_p8 = por %p3208_p7, %p3207_p6 }
  0x2f   :  { %p3210_p9 = pnand %p3209_p8, %p3203_p5 }
  0x31   :  { %3213 = shalt.err (!%p3210_p9)
}
  0x32   :  { %s3247_s0 = smov 64   ;;  %s3248_s28 = smov 4  }
  0x33   :  { %48 = dma.hbm_to_vmem [thread:$0]  %s3355_s3, 4096, %s43_s10, [#allocation6], %s3247_s0, %s3247_s0, %s3248_s28  }
  0x34   :  { %3236 = dma.done.wait [#allocation3], 512  }
  0x35   :  { %3237 = vsyncadd [#allocation3], 4294966784 }
  0x36   :  { %3238 = dma.done.wait [#allocation6], 36864  }
  0x37   :  { %3239 = vsyncadd [#allocation6], 4294930432  ;;  %v2724_v0 = vld [vmem:[#allocation5 + $0x4] ss:$16 sps:$4 sm:$0xff]   ;;  %v2726_v1 = vld [vmem:[#allocation5 + $0xc] ss:$16 sps:$4 sm:$0xff]  }
  0x38   :  { %1651 = vmatprep.subr.bf16.mxu0 %v2724_v0  ;;  %v2728_v2 = vld [vmem:[#allocation5] ss:$16 sps:$4 sm:$0xff]   ;;  %v2729_v3 = vld [vmem:[#allocation5 + $0x8] ss:$16 sps:$4 sm:$0xff]   ;;  %1815 = vmatprep.subr.bf16.mxu1 %v2726_v1  ;;  %v2730_v4 = vld [vmem:[#allocation5 + $0x24] ss:$16 sps:$4 sm:$0xff]  }
  0x39   :  { %1652 = vmatpush1.bf16.msra.mxu0 %v2728_v2  ;;  %1816 = vmatpush1.bf16.msra.mxu1 %v2729_v3  ;;  %v2732_v5 = vld [vmem:[#allocation5 + $0x2c] ss:$16 sps:$4 sm:$0xff]   ;;  %v2734_v6 = vld [vmem:[#allocation5 + $0x20] ss:$16 sps:$4 sm:$0xff]   ;;  %v2735_v7 = vld [vmem:[#allocation5 + $0x28] ss:$16 sps:$4 sm:$0xff]  }
  0x3a   :  { %1653 = vmatprep.subr.bf16.mxu0 %v2730_v4  ;;  %1817 = vmatprep.subr.bf16.mxu1 %v2732_v5  ;;  %v2736_v8 = vld [vmem:[#allocation5 + $0x44] ss:$16 sps:$4 sm:$0xff]   ;;  %v2738_v9 = vld [vmem:[#allocation5 + $0x4c] ss:$16 sps:$4 sm:$0xff]   ;;  %v2740_v10 = vld [vmem:[#allocation5 + $0x40] ss:$16 sps:$4 sm:$0xff]  }
  0x3b   :  { %v2741_v11 = vld [vmem:[#allocation5 + $0x48] ss:$16 sps:$4 sm:$0xff]   ;;  %v2742_v12 = vld [vmem:[#allocation5 + $0x64] ss:$16 sps:$4 sm:$0xff]   ;;  %v2744_v13 = vld [vmem:[#allocation5 + $0x6c] ss:$16 sps:$4 sm:$0xff]  }
  0x3c   :  { %v2746_v14 = vld [vmem:[#allocation5 + $0x60] ss:$16 sps:$4 sm:$0xff]   ;;  %v2747_v15 = vld [vmem:[#allocation5 + $0x68] ss:$16 sps:$4 sm:$0xff]   ;;  %v2748_v16 = vld [vmem:[#allocation5 + $0x84] ss:$16 sps:$4 sm:$0xff]  }
  0x3d   :  { %1654 = vmatpush1.bf16.msra.mxu0 %v2734_v6  ;;  %1818 = vmatpush1.bf16.msra.mxu1 %v2735_v7  ;;  %v2750_v17 = vld [vmem:[#allocation5 + $0x8c] ss:$16 sps:$4 sm:$0xff]   ;;  %v2752_v18 = vld [vmem:[#allocation5 + $0x80] ss:$16 sps:$4 sm:$0xff]   ;;  %v2753_v19 = vld [vmem:[#allocation5 + $0x88] ss:$16 sps:$4 sm:$0xff]  }
  0x3e   :  { %1655 = vmatprep.subr.bf16.mxu0 %v2736_v8  ;;  %1819 = vmatprep.subr.bf16.mxu1 %v2738_v9  ;;  %v2754_v20 = vld [vmem:[#allocation5 + $0xa4] ss:$16 sps:$4 sm:$0xff]   ;;  %v2756_v21 = vld [vmem:[#allocation5 + $0xac] ss:$16 sps:$4 sm:$0xff]   ;;  %v2758_v22 = vld [vmem:[#allocation5 + $0xa0] ss:$16 sps:$4 sm:$0xff]  }
  0x3f   :  { %v2759_v23 = vld [vmem:[#allocation5 + $0xa8] ss:$16 sps:$4 sm:$0xff]   ;;  %v2760_v24 = vld [vmem:[#allocation5 + $0xc4] ss:$16 sps:$4 sm:$0xff]   ;;  %v2762_v25 = vld [vmem:[#allocation5 + $0xcc] ss:$16 sps:$4 sm:$0xff]  }
  0x40   :  { %v2764_v26 = vld [vmem:[#allocation5 + $0xc0] ss:$16 sps:$4 sm:$0xff]   ;;  %v2765_v27 = vld [vmem:[#allocation5 + $0xc8] ss:$16 sps:$4 sm:$0xff]   ;;  %v2766_v28 = vld [vmem:[#allocation5 + $0xe4] ss:$16 sps:$4 sm:$0xff]  }
  0x41   :  { %1656 = vmatpush1.bf16.msra.mxu0 %v2740_v10  ;;  %1820 = vmatpush1.bf16.msra.mxu1 %v2741_v11  ;;  %v2768_v29 = vld [vmem:[#allocation5 + $0xec] ss:$16 sps:$4 sm:$0xff]   ;;  %v2770_v30 = vld [vmem:[#allocation5 + $0xe0] ss:$16 sps:$4 sm:$0xff]   ;;  %v2771_v31 = vld [vmem:[#allocation5 + $0xe8] ss:$16 sps:$4 sm:$0xff]  }
  0x42   :  { %1657 = vmatprep.subr.bf16.mxu0 %v2742_v12  ;;  %1821 = vmatprep.subr.bf16.mxu1 %v2744_v13  ;;  %v2772_v32 = vld [vmem:[#allocation5 + $0x104] ss:$16 sps:$4 sm:$0xff]   ;;  %v2774_v33 = vld [vmem:[#allocation5 + $0x10c] ss:$16 sps:$4 sm:$0xff]   ;;  %v2776_v34 = vld [vmem:[#allocation5 + $0x100] ss:$16 sps:$4 sm:$0xff]  }
  0x43   :  { %v2777_v35 = vld [vmem:[#allocation5 + $0x108] ss:$16 sps:$4 sm:$0xff]   ;;  %v2778_v36 = vld [vmem:[#allocation5 + $0x124] ss:$16 sps:$4 sm:$0xff]   ;;  %v2780_v37 = vld [vmem:[#allocation5 + $0x12c] ss:$16 sps:$4 sm:$0xff]  }
  0x44   :  { %v2782_v38 = vld [vmem:[#allocation5 + $0x120] ss:$16 sps:$4 sm:$0xff]   ;;  %v2783_v39 = vld [vmem:[#allocation5 + $0x128] ss:$16 sps:$4 sm:$0xff]   ;;  %v2784_v40 = vld [vmem:[#allocation5 + $0x144] ss:$16 sps:$4 sm:$0xff]  }
  0x45   :  { %1658 = vmatpush1.bf16.msra.mxu0 %v2746_v14  ;;  %1822 = vmatpush1.bf16.msra.mxu1 %v2747_v15  ;;  %v2786_v41 = vld [vmem:[#allocation5 + $0x14c] ss:$16 sps:$4 sm:$0xff]   ;;  %v2788_v42 = vld [vmem:[#allocation5 + $0x140] ss:$16 sps:$4 sm:$0xff]   ;;  %v2789_v43 = vld [vmem:[#allocation5 + $0x148] ss:$16 sps:$4 sm:$0xff]  }
  0x46   :  { %1659 = vmatprep.subr.bf16.mxu0 %v2748_v16  ;;  %1823 = vmatprep.subr.bf16.mxu1 %v2750_v17  ;;  %v2790_v44 = vld [vmem:[#allocation5 + $0x164] ss:$16 sps:$4 sm:$0xff]   ;;  %v2792_v45 = vld [vmem:[#allocation5 + $0x16c] ss:$16 sps:$4 sm:$0xff]   ;;  %v2794_v47 = vld [vmem:[#allocation5 + $0x160] ss:$16 sps:$4 sm:$0xff]  }
  0x47   :  { %v61_v46 = vld [vmem:[#allocation2] sm:$0xff]  ;;  %v2795_v49 = vld [vmem:[#allocation5 + $0x168] ss:$16 sps:$4 sm:$0xff]   ;;  %v2798_v51 = vld [vmem:[#allocation5 + $0x18c] ss:$16 sps:$4 sm:$0xff]   ;;  %s3249_s8 = smov [#allocation8]  }
  0x48   :  { %v2348_v48 = vcombine.high %v61_v46, %v61_v46  ;;  %v2796_v50 = vld [vmem:[#allocation5 + $0x184] ss:$16 sps:$4 sm:$0xff]   ;;  %v2800_v52 = vld [vmem:[#allocation5 + $0x180] ss:$16 sps:$4 sm:$0xff]   ;;  %v2801_v53 = vld [vmem:[#allocation5 + $0x188] ss:$16 sps:$4 sm:$0xff]   ;;  %v2347_v4 = vcombine.low %v61_v46, %v61_v46 }
  0x49   :  { %1660 = vmatpush1.bf16.msra.mxu0 %v2752_v18  ;;  %1824 = vmatpush1.bf16.msra.mxu1 %v2753_v19  ;;  %v2802_v54 = vld [vmem:[#allocation5 + $0x1a4] ss:$16 sps:$4 sm:$0xff]   ;;  %v2804_v55 = vld [vmem:[#allocation5 + $0x1ac] ss:$16 sps:$4 sm:$0xff]   ;;  %v2806_v56 = vld [vmem:[#allocation5 + $0x1a0] ss:$16 sps:$4 sm:$0xff]  }
  0x4a   :  { %1661 = vmatprep.subr.bf16.mxu0 %v2754_v20  ;;  %1825 = vmatprep.subr.bf16.mxu1 %v2756_v21  ;;  %v2807_v57 = vld [vmem:[#allocation5 + $0x1a8] ss:$16 sps:$4 sm:$0xff]   ;;  %v2808_v58 = vld [vmem:[#allocation5 + $0x1c4] ss:$16 sps:$4 sm:$0xff]   ;;  %v2810_v59 = vld [vmem:[#allocation5 + $0x1cc] ss:$16 sps:$4 sm:$0xff]  }
  0x4b   :  { %1683 = vmatprep.mubr.bf16.mxu0 %v2348_v48  ;;  %1847 = vmatprep.mubr.bf16.mxu1 %v2348_v48  ;;  %v2812_v60 = vld [vmem:[#allocation5 + $0x1c0] ss:$16 sps:$4 sm:$0xff]   ;;  %v2813_v61 = vld [vmem:[#allocation5 + $0x1c8] ss:$16 sps:$4 sm:$0xff]   ;;  %v2814_v62 = vld [vmem:[#allocation5 + $0x1e4] ss:$16 sps:$4 sm:$0xff]  }
  0x4c   :  { %v2816_v63 = vld [vmem:[#allocation5 + $0x1ec] ss:$16 sps:$4 sm:$0xff]   ;;  %v2818_v0 = vld [vmem:[#allocation5 + $0x1e0] ss:$16 sps:$4 sm:$0xff]   ;;  %v2819_v1 = vld [vmem:[#allocation5 + $0x1e8] ss:$16 sps:$4 sm:$0xff]  }
  0x4d   :  { %1662 = vmatpush1.bf16.msra.mxu0 %v2758_v22  ;;  %1826 = vmatpush1.bf16.msra.mxu1 %v2759_v23  ;;  %v2824_v2 = vld [vmem:[#allocation5 + $0x204] ss:$16 sps:$4 sm:$0xff]   ;;  %v2827_v3 = vld [vmem:[#allocation5 + $0x20c] ss:$16 sps:$4 sm:$0xff]   ;;  %v2822_v5 = vld [vmem:[#allocation5 + $0x200] ss:$16 sps:$4 sm:$0xff]  }
  0x4e   :  { %1663 = vmatprep.subr.bf16.mxu0 %v2760_v24  ;;  %1827 = vmatprep.subr.bf16.mxu1 %v2762_v25  ;;  %v2825_v6 = vld [vmem:[#allocation5 + $0x208] ss:$16 sps:$4 sm:$0xff]   ;;  %v2830_v7 = vld [vmem:[#allocation5 + $0x224] ss:$16 sps:$4 sm:$0xff]   ;;  %v2833_v8 = vld [vmem:[#allocation5 + $0x22c] ss:$16 sps:$4 sm:$0xff]  }
  0x4f   :  { %v2828_v9 = vld [vmem:[#allocation5 + $0x220] ss:$16 sps:$4 sm:$0xff]   ;;  %v2831_v10 = vld [vmem:[#allocation5 + $0x228] ss:$16 sps:$4 sm:$0xff]   ;;  %v2836_v11 = vld [vmem:[#allocation5 + $0x244] ss:$16 sps:$4 sm:$0xff]  }
  0x50   :  { %v2839_v12 = vld [vmem:[#allocation5 + $0x24c] ss:$16 sps:$4 sm:$0xff]   ;;  %v2834_v13 = vld [vmem:[#allocation5 + $0x240] ss:$16 sps:$4 sm:$0xff]   ;;  %v2837_v14 = vld [vmem:[#allocation5 + $0x248] ss:$16 sps:$4 sm:$0xff]  }
  0x51   :  { %1664 = vmatpush1.bf16.msra.mxu0 %v2764_v26  ;;  %1828 = vmatpush1.bf16.msra.mxu1 %v2765_v27  ;;  %v2842_v15 = vld [vmem:[#allocation5 + $0x264] ss:$16 sps:$4 sm:$0xff]   ;;  %v2845_v16 = vld [vmem:[#allocation5 + $0x26c] ss:$16 sps:$4 sm:$0xff]   ;;  %v2840_v17 = vld [vmem:[#allocation5 + $0x260] ss:$16 sps:$4 sm:$0xff]  }
  0x52   :  { %1665 = vmatprep.subr.bf16.mxu0 %v2766_v28  ;;  %1829 = vmatprep.subr.bf16.mxu1 %v2768_v29  ;;  %v2843_v18 = vld [vmem:[#allocation5 + $0x268] ss:$16 sps:$4 sm:$0xff]   ;;  %v2848_v19 = vld [vmem:[#allocation5 + $0x284] ss:$16 sps:$4 sm:$0xff]   ;;  %v2851_v20 = vld [vmem:[#allocation5 + $0x28c] ss:$16 sps:$4 sm:$0xff]  }
  0x53   :  { %v2846_v21 = vld [vmem:[#allocation5 + $0x280] ss:$16 sps:$4 sm:$0xff]   ;;  %v2849_v22 = vld [vmem:[#allocation5 + $0x288] ss:$16 sps:$4 sm:$0xff]   ;;  %v2854_v23 = vld [vmem:[#allocation5 + $0x2a4] ss:$16 sps:$4 sm:$0xff]  }
  0x54   :  { %v2857_v24 = vld [vmem:[#allocation5 + $0x2ac] ss:$16 sps:$4 sm:$0xff]   ;;  %v2852_v25 = vld [vmem:[#allocation5 + $0x2a0] ss:$16 sps:$4 sm:$0xff]   ;;  %v2855_v26 = vld [vmem:[#allocation5 + $0x2a8] ss:$16 sps:$4 sm:$0xff]  }
  0x55   :  { %1666 = vmatpush1.bf16.msra.mxu0 %v2770_v30  ;;  %1830 = vmatpush1.bf16.msra.mxu1 %v2771_v31  ;;  %v2860_v27 = vld [vmem:[#allocation5 + $0x2c4] ss:$16 sps:$4 sm:$0xff]   ;;  %v2863_v28 = vld [vmem:[#allocation5 + $0x2cc] ss:$16 sps:$4 sm:$0xff]   ;;  %v2858_v31 = vld [vmem:[#allocation5 + $0x2c0] ss:$16 sps:$4 sm:$0xff]  }
  0x56   :  { %1667 = vmatprep.subr.bf16.mxu0 %v2772_v32  ;;  %1831 = vmatprep.subr.bf16.mxu1 %v2774_v33  ;;  %v3316_v29 = vld [vmem:[#allocation2 + $0x8] sm:$0xff]  ;;  %v2866_v33 = vld [vmem:[#allocation5 + $0x2e4] ss:$16 sps:$4 sm:$0xff]   ;;  %s2337_s9 = sshll.u32 %s3249_s8, 4  ;;  %s2338_s9 = int_to_ptr.vmem [resolvable:$true] %s2337_s9 }
  0x57   :  { %v2350_v30 = vcombine.high %v3316_v29, %v3316_v29  ;;  %v2861_v32 = vld [vmem:[#allocation5 + $0x2c8] ss:$16 sps:$4 sm:$0xff]   ;;  %v2887_v46 = vld [vmem:[#allocation5 + $0x34c] ss:$16 sps:$4 sm:$0xff]   ;;  %s3214_s10 = scalar_lea.vmem %s2338_s9, 128  ;;  %p3219_p11 = scmp.lt.s32.totalorder %s2338_s9, %s2338_s9 }
  0x58   :  { %v2885_v48 = vld [vmem:[#allocation5 + $0x348] ss:$16 sps:$4 sm:$0xff]   ;;  %p3215_p10 = scmp.ne.s32.totalorder %s2338_s9, %s3214_s10  ;;  %p3220_p12 = scmp.lt.s32.totalorder %s3214_s10, %s3214_s10 }
  0x59   :  { %1668 = vmatpush1.bf16.msra.mxu0 %v2776_v34  ;;  %1832 = vmatpush1.bf16.msra.mxu1 %v2777_v35  ;;  %v2869_v34 = vld [vmem:[#allocation5 + $0x2ec] ss:$16 sps:$4 sm:$0xff]   ;;  %v2864_v35 = vld [vmem:[#allocation5 + $0x2e0] ss:$16 sps:$4 sm:$0xff]  }
  0x5a   :  { %1669 = vmatprep.subr.bf16.mxu0 %v2778_v36  ;;  %1833 = vmatprep.subr.bf16.mxu1 %v2780_v37  ;;  %v2867_v36 = vld [vmem:[#allocation5 + $0x2e8] ss:$16 sps:$4 sm:$0xff]   ;;  %v2872_v37 = vld [vmem:[#allocation5 + $0x304] ss:$16 sps:$4 sm:$0xff]   ;;  %p3221_p13 = por %p3220_p12, %p3219_p11 }
  0x5c   :  { %p3222_p0 = pnand %p3221_p13, %p3215_p10 }
  0x5d   :  { %1670 = vmatpush1.bf16.msra.mxu0 %v2782_v38  ;;  %1834 = vmatpush1.bf16.msra.mxu1 %v2783_v39  ;;  %v2875_v38 = vld [vmem:[#allocation5 + $0x30c] ss:$16 sps:$4 sm:$0xff]   ;;  %v2870_v39 = vld [vmem:[#allocation5 + $0x300] ss:$16 sps:$4 sm:$0xff]  }
  0x5e   :  { %1671 = vmatprep.subr.bf16.mxu0 %v2784_v40  ;;  %1835 = vmatprep.subr.bf16.mxu1 %v2786_v41  ;;  %v2873_v40 = vld [vmem:[#allocation5 + $0x308] ss:$16 sps:$4 sm:$0xff]   ;;  %v2878_v41 = vld [vmem:[#allocation5 + $0x324] ss:$16 sps:$4 sm:$0xff]  }
  0x61   :  { %1672 = vmatpush1.bf16.msra.mxu0 %v2788_v42  ;;  %1836 = vmatpush1.bf16.msra.mxu1 %v2789_v43  ;;  %v2881_v42 = vld [vmem:[#allocation5 + $0x32c] ss:$16 sps:$4 sm:$0xff]   ;;  %v2876_v43 = vld [vmem:[#allocation5 + $0x320] ss:$16 sps:$4 sm:$0xff]  }
  0x62   :  { %1673 = vmatprep.subr.bf16.mxu0 %v2790_v44  ;;  %1837 = vmatprep.subr.bf16.mxu1 %v2792_v45  ;;  %v2879_v44 = vld [vmem:[#allocation5 + $0x328] ss:$16 sps:$4 sm:$0xff]   ;;  %v2884_v45 = vld [vmem:[#allocation5 + $0x344] ss:$16 sps:$4 sm:$0xff]  }
  0x65   :  { %1674 = vmatpush1.bf16.msra.mxu0 %v2794_v47  ;;  %1838 = vmatpush1.bf16.msra.mxu1 %v2795_v49  ;;  %v2882_v47 = vld [vmem:[#allocation5 + $0x340] ss:$16 sps:$4 sm:$0xff]   ;;  %v2890_v49 = vld [vmem:[#allocation5 + $0x364] ss:$16 sps:$4 sm:$0xff]  }
  0x66   :  { %1675 = vmatprep.subr.bf16.mxu0 %v2796_v50  ;;  %1839 = vmatprep.subr.bf16.mxu1 %v2798_v51  ;;  %v2893_v50 = vld [vmem:[#allocation5 + $0x36c] ss:$16 sps:$4 sm:$0xff]   ;;  %v2888_v51 = vld [vmem:[#allocation5 + $0x360] ss:$16 sps:$4 sm:$0xff]  }
  0x69   :  { %1676 = vmatpush1.bf16.msra.mxu0 %v2800_v52  ;;  %1840 = vmatpush1.bf16.msra.mxu1 %v2801_v53  ;;  %v2891_v52 = vld [vmem:[#allocation5 + $0x368] ss:$16 sps:$4 sm:$0xff]   ;;  %v2896_v53 = vld [vmem:[#allocation5 + $0x384] ss:$16 sps:$4 sm:$0xff]  }
  0x6a   :  { %1677 = vmatprep.subr.bf16.mxu0 %v2802_v54  ;;  %1841 = vmatprep.subr.bf16.mxu1 %v2804_v55  ;;  %v2899_v54 = vld [vmem:[#allocation5 + $0x38c] ss:$16 sps:$4 sm:$0xff]   ;;  %v2894_v55 = vld [vmem:[#allocation5 + $0x380] ss:$16 sps:$4 sm:$0xff]  }
  0x6d   :  { %1678 = vmatpush1.bf16.msra.mxu0 %v2806_v56  ;;  %1842 = vmatpush1.bf16.msra.mxu1 %v2807_v57  ;;  %v2897_v56 = vld [vmem:[#allocation5 + $0x388] ss:$16 sps:$4 sm:$0xff]   ;;  %v2902_v57 = vld [vmem:[#allocation5 + $0x3a4] ss:$16 sps:$4 sm:$0xff]  }
  0x6e   :  { %1679 = vmatprep.subr.bf16.mxu0 %v2808_v58  ;;  %1843 = vmatprep.subr.bf16.mxu1 %v2810_v59  ;;  %v2905_v58 = vld [vmem:[#allocation5 + $0x3ac] ss:$16 sps:$4 sm:$0xff]   ;;  %v2900_v59 = vld [vmem:[#allocation5 + $0x3a0] ss:$16 sps:$4 sm:$0xff]  }
  0x71   :  { %1680 = vmatpush1.bf16.msra.mxu0 %v2812_v60  ;;  %1844 = vmatpush1.bf16.msra.mxu1 %v2813_v61  ;;  %v2903_v60 = vld [vmem:[#allocation5 + $0x3a8] ss:$16 sps:$4 sm:$0xff]   ;;  %v2908_v61 = vld [vmem:[#allocation5 + $0x3c4] ss:$16 sps:$4 sm:$0xff]  }
  0x72   :  { %1681 = vmatprep.subr.bf16.mxu0 %v2814_v62  ;;  %1845 = vmatprep.subr.bf16.mxu1 %v2816_v63  ;;  %v2911_v62 = vld [vmem:[#allocation5 + $0x3cc] ss:$16 sps:$4 sm:$0xff]   ;;  %v2906_v63 = vld [vmem:[#allocation5 + $0x3c0] ss:$16 sps:$4 sm:$0xff]  }
  0x75   :  { %1682 = vmatpush1.bf16.msra.mxu0 %v2818_v0  ;;  %1846 = vmatpush1.bf16.msra.mxu1 %v2819_v1  ;;  %v2909_v0 = vld [vmem:[#allocation5 + $0x3c8] ss:$16 sps:$4 sm:$0xff]   ;;  %v2914_v1 = vld [vmem:[#allocation5 + $0x3e4] ss:$16 sps:$4 sm:$0xff]  }
  0x76   :  { %1692 = vmatprep.subr.bf16.mxu0 %v2824_v2  ;;  %1856 = vmatprep.subr.bf16.mxu1 %v2827_v3  ;;  %v2917_v2 = vld [vmem:[#allocation5 + $0x3ec] ss:$16 sps:$4 sm:$0xff]   ;;  %v2912_v3 = vld [vmem:[#allocation5 + $0x3e0] ss:$16 sps:$4 sm:$0xff]  }
  0x78   :  { %1684 = vmatmul.mubr.bf16.vlgmr.msra.gmra.mrb[0].mxu0 %v2347_v4  ;;  %1848 = vmatmul.mubr.bf16.vlgmr.msra.gmra.mrb[0].mxu1 %v2347_v4  ;;  %v2915_v4 = vld [vmem:[#allocation5 + $0x3e8] ss:$16 sps:$4 sm:$0xff]  }
  0x79   :  { %1693 = vmatpush1.bf16.msra.mxu0 %v2822_v5  ;;  %1857 = vmatpush1.bf16.msra.mxu1 %v2825_v6  ;;  %v2922_v5 = vld [vmem:[#allocation5 + $0x404] ss:$16 sps:$4 sm:$0xff]   ;;  %v2925_v6 = vld [vmem:[#allocation5 + $0x40c] ss:$16 sps:$4 sm:$0xff]  }
  0x7a   :  { %1694 = vmatprep.subr.bf16.mxu0 %v2830_v7  ;;  %1858 = vmatprep.subr.bf16.mxu1 %v2833_v8  ;;  %v2349_v7 = vcombine.low %v3316_v29, %v3316_v29  ;;  %v2920_v8 = vld [vmem:[#allocation5 + $0x400] ss:$16 sps:$4 sm:$0xff]   ;;  %v2955_v29 = vld [vmem:[#allocation5 + $0x4ac] ss:$16 sps:$4 sm:$0xff]  }
  0x7b   :  { %1724 = vmatprep.mubr.bf16.mxu0 %v2350_v30  ;;  %1888 = vmatprep.mubr.bf16.mxu1 %v2350_v30  ;;  %v2950_v30 = vld [vmem:[#allocation5 + $0x4a0] ss:$16 sps:$4 sm:$0xff]  }
  0x7d   :  { %1695 = vmatpush1.bf16.msra.mxu0 %v2828_v9  ;;  %1859 = vmatpush1.bf16.msra.mxu1 %v2831_v10  ;;  %v2923_v9 = vld [vmem:[#allocation5 + $0x408] ss:$16 sps:$4 sm:$0xff]   ;;  %v2928_v10 = vld [vmem:[#allocation5 + $0x424] ss:$16 sps:$4 sm:$0xff]  }
  0x7e   :  { %1696 = vmatprep.subr.bf16.mxu0 %v2836_v11  ;;  %1860 = vmatprep.subr.bf16.mxu1 %v2839_v12  ;;  %v3322_v11 = vld [vmem:[#allocation2 + $0x10] sm:$0xff]  ;;  %v2931_v12 = vld [vmem:[#allocation5 + $0x42c] ss:$16 sps:$4 sm:$0xff]  }
  0x81   :  { %1697 = vmatpush1.bf16.msra.mxu0 %v2834_v13  ;;  %1861 = vmatpush1.bf16.msra.mxu1 %v2837_v14  ;;  %v2352_v13 = vcombine.high %v3322_v11, %v3322_v11  ;;  %v2926_v14 = vld [vmem:[#allocation5 + $0x420] ss:$16 sps:$4 sm:$0xff]  }
  0x82   :  { %1698 = vmatprep.subr.bf16.mxu0 %v2842_v15  ;;  %1862 = vmatprep.subr.bf16.mxu1 %v2845_v16  ;;  %v2929_v15 = vld [vmem:[#allocation5 + $0x428] ss:$16 sps:$4 sm:$0xff]   ;;  %v2934_v16 = vld [vmem:[#allocation5 + $0x444] ss:$16 sps:$4 sm:$0xff]  }
  0x85   :  { %1699 = vmatpush1.bf16.msra.mxu0 %v2840_v17  ;;  %1863 = vmatpush1.bf16.msra.mxu1 %v2843_v18  ;;  %v2937_v17 = vld [vmem:[#allocation5 + $0x44c] ss:$16 sps:$4 sm:$0xff]   ;;  %v2932_v18 = vld [vmem:[#allocation5 + $0x440] ss:$16 sps:$4 sm:$0xff]  }
  0x86   :  { %1700 = vmatprep.subr.bf16.mxu0 %v2848_v19  ;;  %1864 = vmatprep.subr.bf16.mxu1 %v2851_v20  ;;  %v2935_v19 = vld [vmem:[#allocation5 + $0x448] ss:$16 sps:$4 sm:$0xff]   ;;  %v2940_v20 = vld [vmem:[#allocation5 + $0x464] ss:$16 sps:$4 sm:$0xff]  }
  0x89   :  { %1701 = vmatpush1.bf16.msra.mxu0 %v2846_v21  ;;  %1865 = vmatpush1.bf16.msra.mxu1 %v2849_v22  ;;  %v2943_v21 = vld [vmem:[#allocation5 + $0x46c] ss:$16 sps:$4 sm:$0xff]   ;;  %v2938_v22 = vld [vmem:[#allocation5 + $0x460] ss:$16 sps:$4 sm:$0xff]  }
  0x8a   :  { %1702 = vmatprep.subr.bf16.mxu0 %v2854_v23  ;;  %1866 = vmatprep.subr.bf16.mxu1 %v2857_v24  ;;  %v2941_v23 = vld [vmem:[#allocation5 + $0x468] ss:$16 sps:$4 sm:$0xff]   ;;  %v2946_v24 = vld [vmem:[#allocation5 + $0x484] ss:$16 sps:$4 sm:$0xff]  }
  0x8d   :  { %1703 = vmatpush1.bf16.msra.mxu0 %v2852_v25  ;;  %1867 = vmatpush1.bf16.msra.mxu1 %v2855_v26  ;;  %v2949_v25 = vld [vmem:[#allocation5 + $0x48c] ss:$16 sps:$4 sm:$0xff]   ;;  %v2944_v26 = vld [vmem:[#allocation5 + $0x480] ss:$16 sps:$4 sm:$0xff]  }
  0x8e   :  { %1704 = vmatprep.subr.bf16.mxu0 %v2860_v27  ;;  %1868 = vmatprep.subr.bf16.mxu1 %v2863_v28  ;;  %v2947_v27 = vld [vmem:[#allocation5 + $0x488] ss:$16 sps:$4 sm:$0xff]   ;;  %v2952_v28 = vld [vmem:[#allocation5 + $0x4a4] ss:$16 sps:$4 sm:$0xff]  }
  0x91   :  { %1705 = vmatpush1.bf16.msra.mxu0 %v2858_v31  ;;  %1869 = vmatpush1.bf16.msra.mxu1 %v2861_v32  ;;  %v2953_v31 = vld [vmem:[#allocation5 + $0x4a8] ss:$16 sps:$4 sm:$0xff]   ;;  %v2958_v32 = vld [vmem:[#allocation5 + $0x4c4] ss:$16 sps:$4 sm:$0xff]  }
  0x92   :  { %1706 = vmatprep.subr.bf16.mxu0 %v2866_v33  ;;  %1870 = vmatprep.subr.bf16.mxu1 %v2869_v34  ;;  %v2961_v33 = vld [vmem:[#allocation5 + $0x4cc] ss:$16 sps:$4 sm:$0xff]   ;;  %v2956_v34 = vld [vmem:[#allocation5 + $0x4c0] ss:$16 sps:$4 sm:$0xff]  }
  0x95   :  { %1707 = vmatpush1.bf16.msra.mxu0 %v2864_v35  ;;  %1871 = vmatpush1.bf16.msra.mxu1 %v2867_v36  ;;  %v2959_v35 = vld [vmem:[#allocation5 + $0x4c8] ss:$16 sps:$4 sm:$0xff]   ;;  %v2964_v36 = vld [vmem:[#allocation5 + $0x4e4] ss:$16 sps:$4 sm:$0xff]  }
  0x96   :  { %1708 = vmatprep.subr.bf16.mxu0 %v2872_v37  ;;  %1872 = vmatprep.subr.bf16.mxu1 %v2875_v38  ;;  %v2967_v37 = vld [vmem:[#allocation5 + $0x4ec] ss:$16 sps:$4 sm:$0xff]   ;;  %v2962_v38 = vld [vmem:[#allocation5 + $0x4e0] ss:$16 sps:$4 sm:$0xff]  }
  0x99   :  { %1709 = vmatpush1.bf16.msra.mxu0 %v2870_v39  ;;  %1873 = vmatpush1.bf16.msra.mxu1 %v2873_v40  ;;  %v2965_v39 = vld [vmem:[#allocation5 + $0x4e8] ss:$16 sps:$4 sm:$0xff]   ;;  %v2970_v40 = vld [vmem:[#allocation5 + $0x504] ss:$16 sps:$4 sm:$0xff]  }
  0x9a   :  { %1710 = vmatprep.subr.bf16.mxu0 %v2878_v41  ;;  %1874 = vmatprep.subr.bf16.mxu1 %v2881_v42  ;;  %v2973_v41 = vld [vmem:[#allocation5 + $0x50c] ss:$16 sps:$4 sm:$0xff]   ;;  %v2968_v42 = vld [vmem:[#allocation5 + $0x500] ss:$16 sps:$4 sm:$0xff]  }
  0x9d   :  { %1711 = vmatpush1.bf16.msra.mxu0 %v2876_v43  ;;  %1875 = vmatpush1.bf16.msra.mxu1 %v2879_v44  ;;  %v2971_v43 = vld [vmem:[#allocation5 + $0x508] ss:$16 sps:$4 sm:$0xff]   ;;  %v2976_v44 = vld [vmem:[#allocation5 + $0x524] ss:$16 sps:$4 sm:$0xff]  }
  0x9e   :  { %1712 = vmatprep.subr.bf16.mxu0 %v2884_v45  ;;  %1876 = vmatprep.subr.bf16.mxu1 %v2887_v46  ;;  %v2979_v45 = vld [vmem:[#allocation5 + $0x52c] ss:$16 sps:$4 sm:$0xff]   ;;  %v2974_v46 = vld [vmem:[#allocation5 + $0x520] ss:$16 sps:$4 sm:$0xff]  }
  0xa1   :  { %1713 = vmatpush1.bf16.msra.mxu0 %v2882_v47  ;;  %1877 = vmatpush1.bf16.msra.mxu1 %v2885_v48  ;;  %v2977_v47 = vld [vmem:[#allocation5 + $0x528] ss:$16 sps:$4 sm:$0xff]   ;;  %v2982_v48 = vld [vmem:[#allocation5 + $0x544] ss:$16 sps:$4 sm:$0xff]  }
  0xa2   :  { %1714 = vmatprep.subr.bf16.mxu0 %v2890_v49  ;;  %1878 = vmatprep.subr.bf16.mxu1 %v2893_v50  ;;  %v2985_v49 = vld [vmem:[#allocation5 + $0x54c] ss:$16 sps:$4 sm:$0xff]   ;;  %v2980_v50 = vld [vmem:[#allocation5 + $0x540] ss:$16 sps:$4 sm:$0xff]  }
  0xa5   :  { %1715 = vmatpush1.bf16.msra.mxu0 %v2888_v51  ;;  %1879 = vmatpush1.bf16.msra.mxu1 %v2891_v52  ;;  %v2983_v51 = vld [vmem:[#allocation5 + $0x548] ss:$16 sps:$4 sm:$0xff]   ;;  %v2988_v52 = vld [vmem:[#allocation5 + $0x564] ss:$16 sps:$4 sm:$0xff]  }
  0xa6   :  { %1716 = vmatprep.subr.bf16.mxu0 %v2896_v53  ;;  %1880 = vmatprep.subr.bf16.mxu1 %v2899_v54  ;;  %v2991_v53 = vld [vmem:[#allocation5 + $0x56c] ss:$16 sps:$4 sm:$0xff]   ;;  %v2986_v54 = vld [vmem:[#allocation5 + $0x560] ss:$16 sps:$4 sm:$0xff]  }
  0xa9   :  { %1717 = vmatpush1.bf16.msra.mxu0 %v2894_v55  ;;  %1881 = vmatpush1.bf16.msra.mxu1 %v2897_v56  ;;  %v2989_v55 = vld [vmem:[#allocation5 + $0x568] ss:$16 sps:$4 sm:$0xff]   ;;  %v2994_v56 = vld [vmem:[#allocation5 + $0x584] ss:$16 sps:$4 sm:$0xff]  }
  0xaa   :  { %1718 = vmatprep.subr.bf16.mxu0 %v2902_v57  ;;  %1882 = vmatprep.subr.bf16.mxu1 %v2905_v58  ;;  %v2997_v57 = vld [vmem:[#allocation5 + $0x58c] ss:$16 sps:$4 sm:$0xff]   ;;  %v2992_v58 = vld [vmem:[#allocation5 + $0x580] ss:$16 sps:$4 sm:$0xff]  }
  0xad   :  { %1719 = vmatpush1.bf16.msra.mxu0 %v2900_v59  ;;  %1883 = vmatpush1.bf16.msra.mxu1 %v2903_v60  ;;  %v2995_v59 = vld [vmem:[#allocation5 + $0x588] ss:$16 sps:$4 sm:$0xff]   ;;  %v3000_v60 = vld [vmem:[#allocation5 + $0x5a4] ss:$16 sps:$4 sm:$0xff]  }
  0xae   :  { %1720 = vmatprep.subr.bf16.mxu0 %v2908_v61  ;;  %1884 = vmatprep.subr.bf16.mxu1 %v2911_v62  ;;  %v3003_v61 = vld [vmem:[#allocation5 + $0x5ac] ss:$16 sps:$4 sm:$0xff]   ;;  %v2998_v62 = vld [vmem:[#allocation5 + $0x5a0] ss:$16 sps:$4 sm:$0xff]  }
  0xb1   :  { %1721 = vmatpush1.bf16.msra.mxu0 %v2906_v63  ;;  %1885 = vmatpush1.bf16.msra.mxu1 %v2909_v0  ;;  %v3001_v63 = vld [vmem:[#allocation5 + $0x5a8] ss:$16 sps:$4 sm:$0xff]   ;;  %v3006_v0 = vld [vmem:[#allocation5 + $0x5c4] ss:$16 sps:$4 sm:$0xff]  }
  0xb2   :  { %1722 = vmatprep.subr.bf16.mxu0 %v2914_v1  ;;  %1886 = vmatprep.subr.bf16.mxu1 %v2917_v2  ;;  %v3009_v1 = vld [vmem:[#allocation5 + $0x5cc] ss:$16 sps:$4 sm:$0xff]   ;;  %v3004_v2 = vld [vmem:[#allocation5 + $0x5c0] ss:$16 sps:$4 sm:$0xff]  }
  0xb5   :  { %1723 = vmatpush1.bf16.msra.mxu0 %v2912_v3  ;;  %1887 = vmatpush1.bf16.msra.mxu1 %v2915_v4  ;;  %v3007_v3 = vld [vmem:[#allocation5 + $0x5c8] ss:$16 sps:$4 sm:$0xff]   ;;  %v3012_v4 = vld [vmem:[#allocation5 + $0x5e4] ss:$16 sps:$4 sm:$0xff]  }
  0xb6   :  { %1733 = vmatprep.subr.bf16.mxu0 %v2922_v5  ;;  %1897 = vmatprep.subr.bf16.mxu1 %v2925_v6  ;;  %v3015_v5 = vld [vmem:[#allocation5 + $0x5ec] ss:$16 sps:$4 sm:$0xff]   ;;  %v3010_v6 = vld [vmem:[#allocation5 + $0x5e0] ss:$16 sps:$4 sm:$0xff]  }
  0xb8   :  { %1725 = vmatmul.mubr.bf16.vlgmr.msra.gmra.mrb[0].mxu0 %v2349_v7  ;;  %1889 = vmatmul.mubr.bf16.vlgmr.msra.gmra.mrb[0].mxu1 %v2349_v7  ;;  %v3013_v7 = vld [vmem:[#allocation5 + $0x5e8] ss:$16 sps:$4 sm:$0xff]  }
  0xb9   :  { %1734 = vmatpush1.bf16.msra.mxu0 %v2920_v8  ;;  %1898 = vmatpush1.bf16.msra.mxu1 %v2923_v9  ;;  %v3020_v8 = vld [vmem:[#allocation5 + $0x604] ss:$16 sps:$4 sm:$0xff]   ;;  %v3023_v9 = vld [vmem:[#allocation5 + $0x60c] ss:$16 sps:$4 sm:$0xff]  }
  0xba   :  { %1735 = vmatprep.subr.bf16.mxu0 %v2928_v10  ;;  %1899 = vmatprep.subr.bf16.mxu1 %v2931_v12  ;;  %v3018_v10 = vld [vmem:[#allocation5 + $0x600] ss:$16 sps:$4 sm:$0xff]   ;;  %v3021_v12 = vld [vmem:[#allocation5 + $0x608] ss:$16 sps:$4 sm:$0xff]  }
  0xbb   :  { %1765 = vmatprep.mubr.bf16.mxu0 %v2352_v13  ;;  %1929 = vmatprep.mubr.bf16.mxu1 %v2352_v13  ;;  %v2351_v13 = vcombine.low %v3322_v11, %v3322_v11  ;;  %v3030_v11 = vld [vmem:[#allocation5 + $0x640] ss:$16 sps:$4 sm:$0xff]  }
  0xbd   :  { %1736 = vmatpush1.bf16.msra.mxu0 %v2926_v14  ;;  %1900 = vmatpush1.bf16.msra.mxu1 %v2929_v15  ;;  %v3328_v14 = vld [vmem:[#allocation2 + $0x18] sm:$0xff]  ;;  %v3026_v15 = vld [vmem:[#allocation5 + $0x624] ss:$16 sps:$4 sm:$0xff]  }
  0xbe   :  { %1737 = vmatprep.subr.bf16.mxu0 %v2934_v16  ;;  %1901 = vmatprep.subr.bf16.mxu1 %v2937_v17  ;;  %v3029_v16 = vld [vmem:[#allocation5 + $0x62c] ss:$16 sps:$4 sm:$0xff]   ;;  %v3024_v17 = vld [vmem:[#allocation5 + $0x620] ss:$16 sps:$4 sm:$0xff]  }
  0xc1   :  { %1738 = vmatpush1.bf16.msra.mxu0 %v2932_v18  ;;  %1902 = vmatpush1.bf16.msra.mxu1 %v2935_v19  ;;  %v3027_v18 = vld [vmem:[#allocation5 + $0x628] ss:$16 sps:$4 sm:$0xff]   ;;  %v2354_v19 = vcombine.high %v3328_v14, %v3328_v14 }
  0xc2   :  { %1739 = vmatprep.subr.bf16.mxu0 %v2940_v20  ;;  %1903 = vmatprep.subr.bf16.mxu1 %v2943_v21  ;;  %v3032_v20 = vld [vmem:[#allocation5 + $0x644] ss:$16 sps:$4 sm:$0xff]   ;;  %v3035_v21 = vld [vmem:[#allocation5 + $0x64c] ss:$16 sps:$4 sm:$0xff]  }
  0xc5   :  { %1740 = vmatpush1.bf16.msra.mxu0 %v2938_v22  ;;  %1904 = vmatpush1.bf16.msra.mxu1 %v2941_v23  ;;  %v3033_v22 = vld [vmem:[#allocation5 + $0x648] ss:$16 sps:$4 sm:$0xff]   ;;  %v3038_v23 = vld [vmem:[#allocation5 + $0x664] ss:$16 sps:$4 sm:$0xff]  }
  0xc6   :  { %1741 = vmatprep.subr.bf16.mxu0 %v2946_v24  ;;  %1905 = vmatprep.subr.bf16.mxu1 %v2949_v25  ;;  %v3041_v24 = vld [vmem:[#allocation5 + $0x66c] ss:$16 sps:$4 sm:$0xff]   ;;  %v3036_v25 = vld [vmem:[#allocation5 + $0x660] ss:$16 sps:$4 sm:$0xff]  }
  0xc9   :  { %1742 = vmatpush1.bf16.msra.mxu0 %v2944_v26  ;;  %1906 = vmatpush1.bf16.msra.mxu1 %v2947_v27  ;;  %v3039_v26 = vld [vmem:[#allocation5 + $0x668] ss:$16 sps:$4 sm:$0xff]   ;;  %v3044_v27 = vld [vmem:[#allocation5 + $0x684] ss:$16 sps:$4 sm:$0xff]  }
  0xca   :  { %1743 = vmatprep.subr.bf16.mxu0 %v2952_v28  ;;  %1907 = vmatprep.subr.bf16.mxu1 %v2955_v29  ;;  %v3047_v28 = vld [vmem:[#allocation5 + $0x68c] ss:$16 sps:$4 sm:$0xff]   ;;  %v3042_v29 = vld [vmem:[#allocation5 + $0x680] ss:$16 sps:$4 sm:$0xff]  }
  0xcd   :  { %1744 = vmatpush1.bf16.msra.mxu0 %v2950_v30  ;;  %1908 = vmatpush1.bf16.msra.mxu1 %v2953_v31  ;;  %v3045_v30 = vld [vmem:[#allocation5 + $0x688] ss:$16 sps:$4 sm:$0xff]   ;;  %v3050_v31 = vld [vmem:[#allocation5 + $0x6a4] ss:$16 sps:$4 sm:$0xff]  }
  0xce   :  { %1745 = vmatprep.subr.bf16.mxu0 %v2958_v32  ;;  %1909 = vmatprep.subr.bf16.mxu1 %v2961_v33  ;;  %v3053_v32 = vld [vmem:[#allocation5 + $0x6ac] ss:$16 sps:$4 sm:$0xff]   ;;  %v3048_v33 = vld [vmem:[#allocation5 + $0x6a0] ss:$16 sps:$4 sm:$0xff]  }
  0xd1   :  { %1746 = vmatpush1.bf16.msra.mxu0 %v2956_v34  ;;  %1910 = vmatpush1.bf16.msra.mxu1 %v2959_v35  ;;  %v3051_v34 = vld [vmem:[#allocation5 + $0x6a8] ss:$16 sps:$4 sm:$0xff]   ;;  %v3056_v35 = vld [vmem:[#allocation5 + $0x6c4] ss:$16 sps:$4 sm:$0xff]  }
  0xd2   :  { %1747 = vmatprep.subr.bf16.mxu0 %v2964_v36  ;;  %1911 = vmatprep.subr.bf16.mxu1 %v2967_v37  ;;  %v3059_v36 = vld [vmem:[#allocation5 + $0x6cc] ss:$16 sps:$4 sm:$0xff]   ;;  %v3054_v37 = vld [vmem:[#allocation5 + $0x6c0] ss:$16 sps:$4 sm:$0xff]  }
  0xd5   :  { %1748 = vmatpush1.bf16.msra.mxu0 %v2962_v38  ;;  %1912 = vmatpush1.bf16.msra.mxu1 %v2965_v39  ;;  %v3057_v38 = vld [vmem:[#allocation5 + $0x6c8] ss:$16 sps:$4 sm:$0xff]   ;;  %v3062_v39 = vld [vmem:[#allocation5 + $0x6e4] ss:$16 sps:$4 sm:$0xff]  }
  0xd6   :  { %1749 = vmatprep.subr.bf16.mxu0 %v2970_v40  ;;  %1913 = vmatprep.subr.bf16.mxu1 %v2973_v41  ;;  %v3065_v40 = vld [vmem:[#allocation5 + $0x6ec] ss:$16 sps:$4 sm:$0xff]   ;;  %v3060_v41 = vld [vmem:[#allocation5 + $0x6e0] ss:$16 sps:$4 sm:$0xff]  }
  0xd9   :  { %1750 = vmatpush1.bf16.msra.mxu0 %v2968_v42  ;;  %1914 = vmatpush1.bf16.msra.mxu1 %v2971_v43  ;;  %v3063_v42 = vld [vmem:[#allocation5 + $0x6e8] ss:$16 sps:$4 sm:$0xff]   ;;  %v3068_v43 = vld [vmem:[#allocation5 + $0x704] ss:$16 sps:$4 sm:$0xff]  }
  0xda   :  { %1751 = vmatprep.subr.bf16.mxu0 %v2976_v44  ;;  %1915 = vmatprep.subr.bf16.mxu1 %v2979_v45  ;;  %v3071_v44 = vld [vmem:[#allocation5 + $0x70c] ss:$16 sps:$4 sm:$0xff]   ;;  %v3066_v45 = vld [vmem:[#allocation5 + $0x700] ss:$16 sps:$4 sm:$0xff]  }
  0xdd   :  { %1752 = vmatpush1.bf16.msra.mxu0 %v2974_v46  ;;  %1916 = vmatpush1.bf16.msra.mxu1 %v2977_v47  ;;  %v3069_v46 = vld [vmem:[#allocation5 + $0x708] ss:$16 sps:$4 sm:$0xff]   ;;  %v3074_v47 = vld [vmem:[#allocation5 + $0x724] ss:$16 sps:$4 sm:$0xff]  }
  0xde   :  { %1753 = vmatprep.subr.bf16.mxu0 %v2982_v48  ;;  %1917 = vmatprep.subr.bf16.mxu1 %v2985_v49  ;;  %v3077_v48 = vld [vmem:[#allocation5 + $0x72c] ss:$16 sps:$4 sm:$0xff]   ;;  %v3072_v49 = vld [vmem:[#allocation5 + $0x720] ss:$16 sps:$4 sm:$0xff]  }
  0xe1   :  { %1754 = vmatpush1.bf16.msra.mxu0 %v2980_v50  ;;  %1918 = vmatpush1.bf16.msra.mxu1 %v2983_v51  ;;  %v3075_v50 = vld [vmem:[#allocation5 + $0x728] ss:$16 sps:$4 sm:$0xff]   ;;  %v3080_v51 = vld [vmem:[#allocation5 + $0x744] ss:$16 sps:$4 sm:$0xff]  }
  0xe2   :  { %1755 = vmatprep.subr.bf16.mxu0 %v2988_v52  ;;  %1919 = vmatprep.subr.bf16.mxu1 %v2991_v53  ;;  %v3083_v52 = vld [vmem:[#allocation5 + $0x74c] ss:$16 sps:$4 sm:$0xff]   ;;  %v3078_v53 = vld [vmem:[#allocation5 + $0x740] ss:$16 sps:$4 sm:$0xff]  }
  0xe5   :  { %1756 = vmatpush1.bf16.msra.mxu0 %v2986_v54  ;;  %1920 = vmatpush1.bf16.msra.mxu1 %v2989_v55  ;;  %v3081_v54 = vld [vmem:[#allocation5 + $0x748] ss:$16 sps:$4 sm:$0xff]   ;;  %v3086_v55 = vld [vmem:[#allocation5 + $0x764] ss:$16 sps:$4 sm:$0xff]  }
  0xe6   :  { %1757 = vmatprep.subr.bf16.mxu0 %v2994_v56  ;;  %1921 = vmatprep.subr.bf16.mxu1 %v2997_v57  ;;  %v3089_v56 = vld [vmem:[#allocation5 + $0x76c] ss:$16 sps:$4 sm:$0xff]   ;;  %v3084_v57 = vld [vmem:[#allocation5 + $0x760] ss:$16 sps:$4 sm:$0xff]  }
  0xe9   :  { %1758 = vmatpush1.bf16.msra.mxu0 %v2992_v58  ;;  %1922 = vmatpush1.bf16.msra.mxu1 %v2995_v59  ;;  %v3087_v58 = vld [vmem:[#allocation5 + $0x768] ss:$16 sps:$4 sm:$0xff]   ;;  %v3092_v59 = vld [vmem:[#allocation5 + $0x784] ss:$16 sps:$4 sm:$0xff]  }
  0xea   :  { %1759 = vmatprep.subr.bf16.mxu0 %v3000_v60  ;;  %1923 = vmatprep.subr.bf16.mxu1 %v3003_v61  ;;  %v3095_v60 = vld [vmem:[#allocation5 + $0x78c] ss:$16 sps:$4 sm:$0xff]   ;;  %v3090_v61 = vld [vmem:[#allocation5 + $0x780] ss:$16 sps:$4 sm:$0xff]  }
  0xed   :  { %1760 = vmatpush1.bf16.msra.mxu0 %v2998_v62  ;;  %1924 = vmatpush1.bf16.msra.mxu1 %v3001_v63  ;;  %v3093_v62 = vld [vmem:[#allocation5 + $0x788] ss:$16 sps:$4 sm:$0xff]   ;;  %v3098_v63 = vld [vmem:[#allocation5 + $0x7a4] ss:$16 sps:$4 sm:$0xff]  }
  0xee   :  { %1761 = vmatprep.subr.bf16.mxu0 %v3006_v0  ;;  %1925 = vmatprep.subr.bf16.mxu1 %v3009_v1  ;;  %v3101_v0 = vld [vmem:[#allocation5 + $0x7ac] ss:$16 sps:$4 sm:$0xff]   ;;  %v3096_v1 = vld [vmem:[#allocation5 + $0x7a0] ss:$16 sps:$4 sm:$0xff]  }
  0xf1   :  { %1762 = vmatpush1.bf16.msra.mxu0 %v3004_v2  ;;  %1926 = vmatpush1.bf16.msra.mxu1 %v3007_v3  ;;  %v3099_v2 = vld [vmem:[#allocation5 + $0x7a8] ss:$16 sps:$4 sm:$0xff]   ;;  %v3104_v3 = vld [vmem:[#allocation5 + $0x7c4] ss:$16 sps:$4 sm:$0xff]  }
  0xf2   :  { %1763 = vmatprep.subr.bf16.mxu0 %v3012_v4  ;;  %1927 = vmatprep.subr.bf16.mxu1 %v3015_v5  ;;  %v3107_v4 = vld [vmem:[#allocation5 + $0x7cc] ss:$16 sps:$4 sm:$0xff]   ;;  %v3102_v5 = vld [vmem:[#allocation5 + $0x7c0] ss:$16 sps:$4 sm:$0xff]  }
  0xf5   :  { %1764 = vmatpush1.bf16.msra.mxu0 %v3010_v6  ;;  %1928 = vmatpush1.bf16.msra.mxu1 %v3013_v7  ;;  %v3105_v6 = vld [vmem:[#allocation5 + $0x7c8] ss:$16 sps:$4 sm:$0xff]   ;;  %v3110_v7 = vld [vmem:[#allocation5 + $0x7e4] ss:$16 sps:$4 sm:$0xff]  }
  0xf6   :  { %1774 = vmatprep.subr.bf16.mxu0 %v3020_v8  ;;  %1938 = vmatprep.subr.bf16.mxu1 %v3023_v9  ;;  %v3113_v8 = vld [vmem:[#allocation5 + $0x7ec] ss:$16 sps:$4 sm:$0xff]   ;;  %v3108_v9 = vld [vmem:[#allocation5 + $0x7e0] ss:$16 sps:$4 sm:$0xff]  }
  0xf8   :  { %1766 = vmatmul.mubr.bf16.vlgmr.msra.gmra.mrb[0].mxu0 %v2351_v13  ;;  %1930 = vmatmul.mubr.bf16.vlgmr.msra.gmra.mrb[0].mxu1 %v2351_v13  ;;  %v3117_v13 = vld [vmem:[#allocation7 + $0xc0] sm:$0xff]  }
  0xf9   :  { %1775 = vmatpush1.bf16.msra.mxu0 %v3018_v10  ;;  %1939 = vmatpush1.bf16.msra.mxu1 %v3021_v12  ;;  %v3111_v10 = vld [vmem:[#allocation5 + $0x7e8] ss:$16 sps:$4 sm:$0xff]   ;;  %v3116_v12 = vld [vmem:[#allocation7 + $0x40] sm:$0xff]  }
  0xfa   :  { %1776 = vmatprep.subr.bf16.mxu0 %v3026_v15  ;;  %1940 = vmatprep.subr.bf16.mxu1 %v3029_v16  ;;  %v2353_v15 = vcombine.low %v3328_v14, %v3328_v14  ;;  %v3118_v16 = vld [vmem:[#allocation7] sm:$0xff]   ;;  %v3126_v14 = vld [vmem:[#allocation7 + $0x10] sm:$0xff]  }
  0xfb   :  { %1806 = vmatprep.mubr.bf16.mxu0 %v2354_v19  ;;  %1970 = vmatprep.mubr.bf16.mxu1 %v2354_v19  ;;  %v3121_v19 = vld [vmem:[#allocation7 + $0xc8] sm:$0xff]  }
  0xfd   :  { %1777 = vmatpush1.bf16.msra.mxu0 %v3024_v17  ;;  %1941 = vmatpush1.bf16.msra.mxu1 %v3027_v18  ;;  %v3119_v17 = vld [vmem:[#allocation7 + $0x80] sm:$0xff]   ;;  %v3120_v18 = vld [vmem:[#allocation7 + $0x48] sm:$0xff]  }
  0xfe   :  { %1778 = vmatprep.subr.bf16.mxu0 %v3032_v20  ;;  %1942 = vmatprep.subr.bf16.mxu1 %v3035_v21  ;;  %v3122_v20 = vld [vmem:[#allocation7 + $0x8] sm:$0xff]  }
  0xff   :  { %v3123_v21 = vld [vmem:[#allocation7 + $0x88] sm:$0xff]  }
 0x101   :  { %1779 = vmatpush1.bf16.msra.mxu0 %v3030_v11  ;;  %1943 = vmatpush1.bf16.msra.mxu1 %v3033_v22  ;;  %v3124_v11 = vld [vmem:[#allocation7 + $0x50] sm:$0xff]  }
 0x102   :  { %1780 = vmatprep.subr.bf16.mxu0 %v3038_v23  ;;  %1944 = vmatprep.subr.bf16.mxu1 %v3041_v24  ;;  %v3125_v22 = vld [vmem:[#allocation7 + $0xd0] sm:$0xff]   ;;  %v3128_v24 = vld [vmem:[#allocation7 + $0x58] sm:$0xff]  }
 0x103   :  { %v3127_v23 = vld [vmem:[#allocation7 + $0x90] sm:$0xff]  }
 0x105   :  { %1781 = vmatpush1.bf16.msra.mxu0 %v3036_v25  ;;  %1945 = vmatpush1.bf16.msra.mxu1 %v3039_v26  ;;  %v3129_v25 = vld [vmem:[#allocation7 + $0xd8] sm:$0xff]  }
 0x106   :  { %1782 = vmatprep.subr.bf16.mxu0 %v3044_v27  ;;  %1946 = vmatprep.subr.bf16.mxu1 %v3047_v28  ;;  %v3130_v26 = vld [vmem:[#allocation7 + $0x18] sm:$0xff]   ;;  %v3132_v28 = vld [vmem:[#allocation7 + $0x60] sm:$0xff]  }
 0x107   :  { %v3131_v27 = vld [vmem:[#allocation7 + $0x98] sm:$0xff]  }
 0x109   :  { %1783 = vmatpush1.bf16.msra.mxu0 %v3042_v29  ;;  %1947 = vmatpush1.bf16.msra.mxu1 %v3045_v30  ;;  %v3133_v29 = vld [vmem:[#allocation7 + $0xe0] sm:$0xff]  }
 0x10a   :  { %1784 = vmatprep.subr.bf16.mxu0 %v3050_v31  ;;  %1948 = vmatprep.subr.bf16.mxu1 %v3053_v32  ;;  %v3134_v30 = vld [vmem:[#allocation7 + $0x20] sm:$0xff]   ;;  %v3136_v32 = vld [vmem:[#allocation7 + $0x68] sm:$0xff]  }
 0x10b   :  { %v3135_v31 = vld [vmem:[#allocation7 + $0xa0] sm:$0xff]  }
 0x10d   :  { %1785 = vmatpush1.bf16.msra.mxu0 %v3048_v33  ;;  %1949 = vmatpush1.bf16.msra.mxu1 %v3051_v34  ;;  %v3137_v33 = vld [vmem:[#allocation7 + $0xe8] sm:$0xff]  }
 0x10e   :  { %1786 = vmatprep.subr.bf16.mxu0 %v3056_v35  ;;  %1950 = vmatprep.subr.bf16.mxu1 %v3059_v36  ;;  %v3138_v34 = vld [vmem:[#allocation7 + $0x28] sm:$0xff]   ;;  %v3140_v36 = vld [vmem:[#allocation7 + $0x70] sm:$0xff]  }
 0x10f   :  { %v3139_v35 = vld [vmem:[#allocation7 + $0xa8] sm:$0xff]  }
 0x111   :  { %1787 = vmatpush1.bf16.msra.mxu0 %v3054_v37  ;;  %1951 = vmatpush1.bf16.msra.mxu1 %v3057_v38  ;;  %v3141_v37 = vld [vmem:[#allocation7 + $0xf0] sm:$0xff]  }
 0x112   :  { %1788 = vmatprep.subr.bf16.mxu0 %v3062_v39  ;;  %1952 = vmatprep.subr.bf16.mxu1 %v3065_v40  ;;  %v3142_v38 = vld [vmem:[#allocation7 + $0x30] sm:$0xff]   ;;  %v3144_v40 = vld [vmem:[#allocation7 + $0x78] sm:$0xff]  }
 0x113   :  { %v3143_v39 = vld [vmem:[#allocation7 + $0xb0] sm:$0xff]  }
 0x115   :  { %1789 = vmatpush1.bf16.msra.mxu0 %v3060_v41  ;;  %1953 = vmatpush1.bf16.msra.mxu1 %v3063_v42  ;;  %v3145_v41 = vld [vmem:[#allocation7 + $0xf8] sm:$0xff]  }
 0x116   :  { %1790 = vmatprep.subr.bf16.mxu0 %v3068_v43  ;;  %1954 = vmatprep.subr.bf16.mxu1 %v3071_v44  ;;  %v3146_v42 = vld [vmem:[#allocation7 + $0x38] sm:$0xff]   ;;  %v323_v44 = vlaneseq }
 0x117   :  { %v3147_v43 = vld [vmem:[#allocation7 + $0xb8] sm:$0xff]  }
 0x119   :  { %1791 = vmatpush1.bf16.msra.mxu0 %v3066_v45  ;;  %1955 = vmatpush1.bf16.msra.mxu1 %v3069_v46  ;;  %v324_v45 = vshrl.u32 %v323_v44, 7 }
 0x11a   :  { %1792 = vmatprep.subr.bf16.mxu0 %v3074_v47  ;;  %1956 = vmatprep.subr.bf16.mxu1 %v3077_v48  ;;  %v321_v48 = vld [vmem:[%s3354_s2] sm:$0xf] }
 0x11b   :  { %v325_v46 = vsub.s32 0, %v324_v45  ;;  %v333_v47 = vsub.s32 2, %v324_v45 }
 0x11d   :  { %1793 = vmatpush1.bf16.msra.mxu0 %v3072_v49  ;;  %1957 = vmatpush1.bf16.msra.mxu1 %v3075_v50  ;;  %v329_v49 = vsub.s32 1, %v324_v45  ;;  %v337_v50 = vsub.s32 3, %v324_v45 }
 0x11e   :  { %1794 = vmatprep.subr.bf16.mxu0 %v3080_v51  ;;  %1958 = vmatprep.subr.bf16.mxu1 %v3083_v52  ;;  %v326_v51 = vrot.slane %v321_v48, %v325_v46  ;;  %v334_v52 = vrot.slane %v321_v48, %v333_v47 }
 0x121   :  { %1795 = vmatpush1.bf16.msra.mxu0 %v3078_v53  ;;  %1959 = vmatpush1.bf16.msra.mxu1 %v3081_v54  ;;  %v330_v53 = vrot.slane %v321_v48, %v329_v49  ;;  %v338_v54 = vrot.slane %v321_v48, %v337_v50 }
 0x122   :  { %1796 = vmatprep.subr.bf16.mxu0 %v3086_v55  ;;  %1960 = vmatprep.subr.bf16.mxu1 %v3089_v56 }
 0x125   :  { %1797 = vmatpush1.bf16.msra.mxu0 %v3084_v57  ;;  %1961 = vmatpush1.bf16.msra.mxu1 %v3087_v58 }
 0x126   :  { %1798 = vmatprep.subr.bf16.mxu0 %v3092_v59  ;;  %1962 = vmatprep.subr.bf16.mxu1 %v3095_v60 }
 0x129   :  { %1799 = vmatpush1.bf16.msra.mxu0 %v3090_v61  ;;  %1963 = vmatpush1.bf16.msra.mxu1 %v3093_v62 }
 0x12a   :  { %1800 = vmatprep.subr.bf16.mxu0 %v3098_v63  ;;  %1964 = vmatprep.subr.bf16.mxu1 %v3101_v0 }
 0x12d   :  { %1801 = vmatpush1.bf16.msra.mxu0 %v3096_v1  ;;  %1965 = vmatpush1.bf16.msra.mxu1 %v3099_v2 }
 0x12e   :  { %1802 = vmatprep.subr.bf16.mxu0 %v3104_v3  ;;  %1966 = vmatprep.subr.bf16.mxu1 %v3107_v4 }
 0x131   :  { %1803 = vmatpush1.bf16.msra.mxu0 %v3102_v5  ;;  %1967 = vmatpush1.bf16.msra.mxu1 %v3105_v6 }
 0x132   :  { %1804 = vmatprep.subr.bf16.mxu0 %v3110_v7  ;;  %1968 = vmatprep.subr.bf16.mxu1 %v3113_v8 }
 0x135   :  { %1805 = vmatpush1.bf16.msra.mxu0 %v3108_v9  ;;  %1969 = vmatpush1.bf16.msra.mxu1 %v3111_v10 }
 0x136   :  { %2644 = vmatprep.subr.bf16.mxu0 %v3116_v12  ;;  %2666 = vmatprep.subr.bf16.mxu1 %v3117_v13 }
 0x138   :  { %1807 = vmatmul.mubr.bf16.vlgmr.msra.gmra.mrb[0].mxu0 %v2353_v15  ;;  %1971 = vmatmul.mubr.bf16.vlgmr.msra.gmra.mrb[0].mxu1 %v2353_v15  ;;  %v2611_v15 = vld [vmem:[%s3356_s4] ss:$0 sm:$0xff] }
 0x139   :  { %2645 = vmatpush3.bf16.msra.mxu0 %v3118_v16  ;;  %2667 = vmatpush3.bf16.msra.mxu1 %v3119_v17 }
 0x13a   :  { %2646 = vmatprep.subr.bf16.mxu0 %v3120_v18  ;;  %2668 = vmatprep.subr.bf16.mxu1 %v3121_v19 }
 0x13d   :  { %2647 = vmatpush3.bf16.msra.mxu0 %v3122_v20  ;;  %2669 = vmatpush3.bf16.msra.mxu1 %v3123_v21 }
 0x13e   :  { %2648 = vmatprep.subr.bf16.mxu0 %v3124_v11  ;;  %2670 = vmatprep.subr.bf16.mxu1 %v3125_v22 }
 0x141   :  { %2649 = vmatpush3.bf16.msra.mxu0 %v3126_v14  ;;  %2671 = vmatpush3.bf16.msra.mxu1 %v3127_v23 }
 0x142   :  { %2650 = vmatprep.subr.bf16.mxu0 %v3128_v24  ;;  %2672 = vmatprep.subr.bf16.mxu1 %v3129_v25 }
 0x145   :  { %2651 = vmatpush3.bf16.msra.mxu0 %v3130_v26  ;;  %2673 = vmatpush3.bf16.msra.mxu1 %v3131_v27 }
 0x146   :  { %2652 = vmatprep.subr.bf16.mxu0 %v3132_v28  ;;  %2674 = vmatprep.subr.bf16.mxu1 %v3133_v29 }
 0x149   :  { %2653 = vmatpush3.bf16.msra.mxu0 %v3134_v30  ;;  %2675 = vmatpush3.bf16.msra.mxu1 %v3135_v31 }
 0x14a   :  { %2654 = vmatprep.subr.bf16.mxu0 %v3136_v32  ;;  %2676 = vmatprep.subr.bf16.mxu1 %v3137_v33 }
 0x14d   :  { %2655 = vmatpush3.bf16.msra.mxu0 %v3138_v34  ;;  %2677 = vmatpush3.bf16.msra.mxu1 %v3139_v35 }
 0x14e   :  { %2656 = vmatprep.subr.bf16.mxu0 %v3140_v36  ;;  %2678 = vmatprep.subr.bf16.mxu1 %v3141_v37 }
 0x151   :  { %2657 = vmatpush3.bf16.msra.mxu0 %v3142_v38  ;;  %2679 = vmatpush3.bf16.msra.mxu1 %v3143_v39 }
 0x152   :  { %2658 = vmatprep.subr.bf16.mxu0 %v3144_v40  ;;  %2680 = vmatprep.subr.bf16.mxu1 %v3145_v41 }
 0x155   :  { %2659 = vmatpush3.bf16.msra.mxu0 %v3146_v42  ;;  %2681 = vmatpush3.bf16.msra.mxu1 %v3147_v43 }
 0x20b   :  { %v1808_v55 = vpop.f32.mrb[0].mxu0  ;;  %v1972_v56 = vpop.f32.mrb[0].mxu1 }
 0x20c   :  { %v2688_v57 = vadd.f32 %v1808_v55, %v326_v51  ;;  %v2690_v58 = vadd.f32 %v1972_v56, %v334_v52  ;;  %v1810_v59 = vpop.f32.mrb[1].mxu0  ;;  %v1974_v60 = vpop.f32.mrb[1].mxu1 }
 0x20d   :  { %v2689_v61 = vadd.f32 %v1810_v59, %v330_v53  ;;  %v2691_v62 = vadd.f32 %v1974_v60, %v338_v54  ;;  %v1812_v63 = vpop.f32.mrb[2].mxu0  ;;  %v1976_v0 = vpop.f32.mrb[2].mxu1 }
 0x20e   :  { %v1979_v1 = vmax.f32 %v2688_v57, 0.0  ;;  %v1981_v2 = vmax.f32 %v2690_v58, 0.0  ;;  %v1813_v3 = vpop.f32.mrb[3].mxu0  ;;  %v1977_v4 = vpop.f32.mrb[3].mxu1 }
 0x20f   :  { %v1980_v5 = vmax.f32 %v2689_v61, 0.0  ;;  %v1982_v6 = vmax.f32 %v2691_v62, 0.0 }
 0x210   :  { %v1983_v9 = vpack.c.bf16 %v1979_v1, %v1979_v1  ;;  %v1985_v10 = vpack.c.bf16 %v1981_v2, %v1981_v2 }
 0x211   :  { %v1984_v7 = vpack.c.bf16 %v1980_v5, %v1980_v5  ;;  %v1986_v8 = vpack.c.bf16 %v1982_v6, %v1982_v6 }
 0x213   :  { %2282 = vmatprep.mubr.bf16.mxu0 %v1984_v7  ;;  %2322 = vmatprep.mubr.bf16.mxu1 %v1986_v8 }
 0x214   :  { %2283 = vmatmul.mubr.bf16.vlgmr.msra.gmra.mrb[4].mxu0 %v1983_v9  ;;  %2323 = vmatmul.mubr.bf16.vlgmr.msra.gmra.mrb[4].mxu1 %v1985_v10 }
 0x2e7   :  { %v2660_v12 = vpop.f32.mrb[4].mxu0  ;;  %v2682_v13 = vpop.f32.mrb[4].mxu1 }
 0x2e8   :  { %v2661_v16 = vpop.f32.mrb[5].mxu0  ;;  %v2683_v17 = vpop.f32.mrb[5].mxu1 }
 0x2e9   :  { %v2662_v18 = vadd.f32 %v2661_v16, %v2660_v12  ;;  %v2684_v19 = vadd.f32 %v2683_v17, %v2682_v13  ;;  %v2663_v20 = vpop.f32.mrb[6].mxu0  ;;  %v2685_v21 = vpop.f32.mrb[6].mxu1 }
 0x2ea   :  { %v2664_v11 = vpop.f32.mrb[7].mxu0  ;;  %v2686_v22 = vpop.f32.mrb[7].mxu1 }
 0x2eb   :  { %v2285_v14 = vadd.f32 %v2662_v18, %v2611_v15 }
 0x2ed   :  { %v2325_v23 = vadd.f32 %v2684_v19, %v2285_v14 }
 0x2ef   :  { %2330 = vst [vmem:[#allocation8] sm:$0xff] %v2325_v23 }
 0x2f0   :  { %3225 = shalt.err (!%p3222_p0)
}
 0x2f1   :  { %s3226_s12 = scalar_lea.hbm %s3357_s5, 128 }
 0x2f2   :  { %p3227_p1 = scmp.ne.s32.totalorder %s3357_s5, %s3226_s12  ;;  %p3230_p2 = scmp.lt.u32.totalorder %s3226_s12, %s3357_s5 }
 0x2f4   :  { %p3232_p3 = pnand %p3230_p2, %p3227_p1 }
 0x2f6   :  { %3235 = shalt.err (!%p3232_p3)
}
 0x2f7   :  { %2340 = dma.vmem_to_hbm [thread:$0]  %s2338_s9, 128, %s3357_s5, [#allocation4]  }
 0x2f8   :  { %3240 = dma.done.wait [#allocation4], 128  }
 0x2f9   :  { %3241 = vsyncadd [#allocation4], 4294967168 }
 0x2fa   :  { %2344 = vsyncpa [#allocation3], 1 }
 0x2fb   :  { %2345 = vsyncpa [#allocation6], 1 }
 0x2fc   :  { %2346 = vsyncpa [#allocation4], 1 }

</bundles_post_ra>
